<compile_context>
chip_gen: v7x
topology: tpu7x:2x2x1
jax: 0.10.0
libtpu: 0.0.40
codegen_flags: <defaults>
</compile_context>

<pallas_src>
import jax
import jax.numpy as jnp
from jax.experimental import pallas as pl
from jax.experimental.pallas import tpu as pltpu


def _round_up(x: int, m: int) -> int:
    return ((x + m - 1) // m) * m


def _pool_linear_kernel(x_ref, w_ref, b_ref, o_ref, acc_ref):
    # x_ref:   (TB, C, S_tile)   streamed spatial tile
    # w_ref:   (C, NC_pad)       weight with 1/S folded in (resident)
    # b_ref:   (1, NC_pad)       bias (resident)
    # o_ref:   (TB, NC_pad)      output block (resident across the S axis)
    # acc_ref: (TB, C) f32       spatial-sum accumulator (VMEM scratch)
    k = pl.program_id(1)

    @pl.when(k == 0)
    def _():
        acc_ref[...] = jnp.zeros_like(acc_ref)

    # Partial spatial sum for this S tile (zero-padding contributes nothing).
    acc_ref[...] += jnp.sum(x_ref[...], axis=-1)

    @pl.when(k == pl.num_programs(1) - 1)
    def _():
        # (TB, C) @ (C, NC_pad) on the MXU; 1/S already folded into w_ref.
        logits = jnp.dot(acc_ref[...], w_ref[...],
                         preferred_element_type=jnp.float32) + b_ref[...]
        o_ref[...] = logits.astype(o_ref.dtype)


def base_model_forward(x_ncdhw, weight, bias):
    """x_ncdhw: (N, C, D, H, W); weight: (C, num_classes); bias: (num_classes,)."""
    n, c, d, h, w = x_ncdhw.shape
    num_classes = weight.shape[1]
    s = d * h * w

    # ---- host-side glue: flatten spatial dims, fold 1/S into the weight ----
    x_flat = x_ncdhw.reshape(n, c, s).astype(jnp.float32)
    w_scaled = weight.astype(jnp.float32) * (1.0 / s)

    # Pad the class dim up to a lane-dense multiple of 128 (unmasked stores).
    nc_pad = _round_up(num_classes, 128)
    w_p = jnp.zeros((c, nc_pad), jnp.float32).at[:, :num_classes].set(w_scaled)
    b_p = jnp.zeros((1, nc_pad), jnp.float32).at[0, :num_classes].set(
        bias.astype(jnp.float32))

    # ---- batch (TB) tile: fill sublanes, amortize per-step overhead ----
    tb = min(128, _round_up(n, 8))
    n_pad = _round_up(n, tb)
    # Prefer >= 2 blocks along the parallel axis when N allows (v7x: 2 TCs).
    if n_pad // tb < 2 and tb > 8:
        tb = max(8, _round_up(tb // 2, 8))
        n_pad = _round_up(n, tb)

    # ---- spatial (S) tile: bound the double-buffered input block in VMEM ----
    # Keep 2 (double-buffer) * TB * C * S_tile * 4B under ~24 MiB so the whole
    # kernel fits v7x's 64 MiB VMEM with headroom (and v5e/v6e trivially).
    vmem_budget = 24 * 1024 * 1024
    bytes_per_lane = tb * c * 4 * 2  # 2 = double buffering
    s_tile_max = max(512, (vmem_budget // bytes_per_lane) // 512 * 512)
    if s <= s_tile_max:
        s_tile, s_pad = s, s            # single S block == full extent
    else:
        s_tile = s_tile_max             # multiple of 512 lanes
        s_pad = _round_up(s, s_tile)

    if (n_pad, s_pad) != (n, s):
        x_flat = jnp.pad(x_flat, ((0, n_pad - n), (0, 0), (0, s_pad - s)))

    grid = (n_pad // tb, s_pad // s_tile)

    out = pl.pallas_call(
        _pool_linear_kernel,
        out_shape=jax.ShapeDtypeStruct((n_pad, nc_pad), jnp.float32),
        grid_spec=pltpu.PrefetchScalarGridSpec(
            num_scalar_prefetch=0,
            grid=grid,
            in_specs=[
                pl.BlockSpec((tb, c, s_tile), lambda i, k: (i, 0, k)),
                pl.BlockSpec((c, nc_pad), lambda i, k: (0, 0)),
                pl.BlockSpec((1, nc_pad), lambda i, k: (0, 0)),
            ],
            out_specs=pl.BlockSpec((tb, nc_pad), lambda i, k: (i, 0)),
            scratch_shapes=[pltpu.VMEM((tb, c), jnp.float32)],
        ),
        compiler_params=pltpu.CompilerParams(
            dimension_semantics=("parallel", "arbitrary"),
            vmem_limit_bytes=48 * 1024 * 1024,
        ),
    )(x_flat, w_p, b_p)

    return out[:n, :num_classes]


if __name__ == "__main__":
    # Small shapes consistent with input_shape=(channels, depth, height, width)
    batch, channels, depth, height, width = 2, 4, 8, 16, 16
    num_classes = 10

    key = jax.random.PRNGKey(0)
    kx, kw, kb = jax.random.split(key, 3)
    x = jax.random.normal(kx, (batch, channels, depth, height, width), jnp.float32)
    # Deterministic parameter init (no checkpoint loading).
    weight = jax.random.normal(kw, (channels, num_classes), jnp.float32) * 0.1
    bias = jax.random.normal(kb, (num_classes,), jnp.float32) * 0.01

    out = base_model_forward(x, weight, bias)
    out = jax.block_until_ready(out)

    # Pure-JAX reference of the same forward semantics.
    ref = jnp.mean(x.reshape(batch, channels, -1), axis=-1) @ weight + bias
    assert out.shape == (batch, num_classes)
    assert jnp.allclose(out, ref, atol=1e-5, rtol=1e-5)

    print("KERNEL_OK")
</pallas_src>

<mosaic_0001>
module attributes {stable_mosaic.version = 11 : i64} {
  func.func @_pool_linear_kernel(%arg0: i32, %arg1: i32, %arg2: memref<8x4x2048xf32, #tpu.memory_space<vmem>>, %arg3: memref<4x128xf32, #tpu.memory_space<vmem>>, %arg4: memref<1x128xf32, #tpu.memory_space<vmem>>, %arg5: memref<8x128xf32, #tpu.memory_space<vmem>>, %arg6: memref<8x4xf32, #tpu.memory_space<vmem>>) attributes {dimension_semantics = [#tpu.dimension_semantics<parallel>, #tpu.dimension_semantics<arbitrary>], iteration_bounds = array<i64: 1, 1>, scalar_prefetch = 0 : i64, scratch_operands = 1 : i64, tpu.core_type = #tpu.core_type<tc>, window_params = [{transform_indices = @transform_0, window_bounds = array<i64: 8, 4, 2048>}, {pipeline_mode = #tpu.pipeline_mode<synchronous>, transform_indices = @transform_1, window_bounds = array<i64: 4, 128>}, {pipeline_mode = #tpu.pipeline_mode<synchronous>, transform_indices = @transform_2, window_bounds = array<i64: 1, 128>}, {transform_indices = @transform_3, window_bounds = array<i64: 8, 128>}]} {
    %c0_i32 = arith.constant 0 : i32
    %0 = arith.cmpi eq, %arg1, %c0_i32 : i32
    %1 = arith.extui %0 : i1 to i32
    %c0_i32_0 = arith.constant 0 : i32
    %2 = arith.cmpi ne, %1, %c0_i32_0 : i32
    scf.if %2 {
      %cst_9 = arith.constant 0.000000e+00 : f32
      %11 = vector.broadcast %cst_9 : f32 to vector<8x4xf32>
      %c0_10 = arith.constant 0 : index
      %c0_11 = arith.constant 0 : index
      %12 = vector.load %arg6[%c0_10, %c0_11] : memref<8x4xf32, #tpu.memory_space<vmem>>, vector<8x4xf32>
      tpu.vector_store %arg6[%c0_10, %c0_11], %11 {strides = array<i32>} : memref<8x4xf32, #tpu.memory_space<vmem>>, vector<8x4xf32>,
    } else {
    }
    %c0 = arith.constant 0 : index
    %c0_1 = arith.constant 0 : index
    %3 = vector.load %arg6[%c0, %c0_1] : memref<8x4xf32, #tpu.memory_space<vmem>>, vector<8x4xf32>
    %c0_2 = arith.constant 0 : index
    %c0_3 = arith.constant 0 : index
    %c0_4 = arith.constant 0 : index
    %4 = vector.load %arg2[%c0_2, %c0_3, %c0_4] : memref<8x4x2048xf32, #tpu.memory_space<vmem>>, vector<8x4x2048xf32>
    %cst = arith.constant dense<0.000000e+00> : vector<8x4xf32>
    %5 = vector.multi_reduction <add>, %4, %cst [2] : vector<8x4x2048xf32> to vector<8x4xf32>
    %6 = arith.addf %3, %5 : vector<8x4xf32>
    %c0_5 = arith.constant 0 : index
    %c0_6 = arith.constant 0 : index
    %7 = vector.load %arg6[%c0_5, %c0_6] : memref<8x4xf32, #tpu.memory_space<vmem>>, vector<8x4xf32>
    tpu.vector_store %arg6[%c0_5, %c0_6], %6 {strides = array<i32>} : memref<8x4xf32, #tpu.memory_space<vmem>>, vector<8x4xf32>,
    %c0_i32_7 = arith.constant 0 : i32
    %8 = arith.cmpi eq, %arg1, %c0_i32_7 : i32
    %9 = arith.extui %8 : i1 to i32
    %c0_i32_8 = arith.constant 0 : i32
    %10 = arith.cmpi ne, %9, %c0_i32_8 : i32
    scf.if %10 {
      %c0_9 = arith.constant 0 : index
      %c0_10 = arith.constant 0 : index
      %11 = vector.load %arg6[%c0_9, %c0_10] : memref<8x4xf32, #tpu.memory_space<vmem>>, vector<8x4xf32>
      %c0_11 = arith.constant 0 : index
      %c0_12 = arith.constant 0 : index
      %12 = vector.load %arg3[%c0_11, %c0_12] : memref<4x128xf32, #tpu.memory_space<vmem>>, vector<4x128xf32>
      %cst_13 = arith.constant dense<0.000000e+00> : vector<8x128xf32>
      %13 = tpu.matmul %11, %12, %cst_13 {dimension_numbers = #tpu.dot_dimension_numbers<[1], [0], [0], [1], [0, 0, 1, 1], [], []>} : vector<8x4xf32>, vector<4x128xf32>, vector<8x128xf32> -> vector<8x128xf32>
      %c0_14 = arith.constant 0 : index
      %c0_15 = arith.constant 0 : index
      %14 = vector.load %arg4[%c0_14, %c0_15] : memref<1x128xf32, #tpu.memory_space<vmem>>, vector<1x128xf32>
      %15 = vector.broadcast %14 : vector<1x128xf32> to vector<8x128xf32>
      %16 = arith.addf %13, %15 : vector<8x128xf32>
      %c0_16 = arith.constant 0 : index
      %c0_17 = arith.constant 0 : index
      %17 = vector.load %arg5[%c0_16, %c0_17] : memref<8x128xf32, #tpu.memory_space<vmem>>, vector<8x128xf32>
      tpu.vector_store %arg5[%c0_16, %c0_17], %16 {strides = array<i32>} : memref<8x128xf32, #tpu.memory_space<vmem>>, vector<8x128xf32>,
    } else {
    }
    return
  }
  func.func @transform_0(%arg0: i32, %arg1: i32) -> (i32, i32, i32) {
    %c0_i32 = arith.constant 0 : i32
    %c0_i32_0 = arith.constant 0 : i32
    return %arg0, %c0_i32, %arg1 : i32, i32, i32
  }
  func.func @transform_1(%arg0: i32, %arg1: i32) -> (i32, i32) {
    %c0_i32 = arith.constant 0 : i32
    %c0_i32_0 = arith.constant 0 : i32
    %c0_i32_1 = arith.constant 0 : i32
    return %c0_i32, %c0_i32_0 : i32, i32
  }
  func.func @transform_2(%arg0: i32, %arg1: i32) -> (i32, i32) {
    %c0_i32 = arith.constant 0 : i32
    %c0_i32_0 = arith.constant 0 : i32
    %c0_i32_1 = arith.constant 0 : i32
    return %c0_i32, %c0_i32_0 : i32, i32
  }
  func.func @transform_3(%arg0: i32, %arg1: i32) -> (i32, i32) {
    %c0_i32 = arith.constant 0 : i32
    %c0_i32_0 = arith.constant 0 : i32
    return %arg0, %c0_i32 : i32, i32
  }
}

</mosaic_0001>

<bundles_post_ra>
// kernel: tpu_custom_call.1
= control target key start
LH: loop header
LB: loop body
LE: loop exit
PB: predicated region body
PF: predicated region fallthrough
CT: control target
= control target key end

     0   :  { %8 = vsyncpa [#allocation4], 0  ;;  %s1085_s0 = inlined_call_operand.hbm [shape: f32[8,4,2048], index: 0, kind: input, shape index: {}]   ;;  %s1086_s1 = inlined_call_operand.hbm [shape: f32[4,128], index: 1, kind: input, shape index: {}]   ;;  %s1087_s2 = inlined_call_operand.vmem [shape: f32[1,128], index: 2, kind: input, shape index: {}]   ;;  %s1088_s3 = inlined_call_operand.hbm [shape: f32[8,128], index: 3, kind: output, shape index: {}]  }
   0x1   :  { %9 = vsyncpa [#allocation7], 0 }
   0x2   :  { %10 = vsyncpa [#allocation5], 0  ;;  %s887_s12 = smov [#allocation3]   ;;  %s815_s16 = scalar_lea.hbm %s1085_s0, 8192 }
   0x3   :  { %s16_s13 = sshll.u32 %s887_s12, 4  ;;  %p816_p0 = scmp.ne.s32.totalorder %s1085_s0, %s815_s16  ;;  %s17_s13 = int_to_ptr.vmem [resolvable:$true] %s16_s13 }
   0x4   :  { %p819_p1 = scmp.lt.u32.totalorder %s815_s16, %s1085_s0 }
   0x6   :  { %p821_p2 = pnand %p819_p1, %p816_p0 }
   0x8   :  { %824 = shalt.err (!%p821_p2)
}
   0x9   :  { %s825_s21 = scalar_lea.vmem %s17_s13, 8192  ;;  %p830_p4 = scmp.lt.s32.totalorder %s17_s13, %s17_s13 }
   0xa   :  { %p826_p3 = scmp.ne.s32.totalorder %s17_s13, %s825_s21  ;;  %p831_p5 = scmp.lt.s32.totalorder %s825_s21, %s825_s21 }
   0xc   :  { %p832_p6 = por %p831_p5, %p830_p4 }
   0xe   :  { %p833_p7 = pnand %p832_p6, %p826_p3 }
  0x10   :  { %836 = shalt.err (!%p833_p7)
}
  0x11   :  { %s888_s22 = smov 1024   ;;  %s889_s23 = smov 64  }
  0x12   :  { %22 = dma.hbm_to_vmem [thread:$0]  %s1085_s0, 8192, %s17_s13, [#allocation4], %s888_s22, %s888_s22, %s889_s23  }
  0x13   :  { %s890_s26 = smov [#allocation6]   ;;  %s837_s30 = scalar_lea.hbm %s1086_s1, 64 }
  0x14   :  { %s29_s27 = sshll.u32 %s890_s26, 4  ;;  %p838_p8 = scmp.ne.s32.totalorder %s1086_s1, %s837_s30  ;;  %s30_s27 = int_to_ptr.vmem [resolvable:$true] %s29_s27 }
  0x15   :  { %p841_p9 = scmp.lt.u32.totalorder %s837_s30, %s1086_s1 }
  0x17   :  { %p843_p10 = pnand %p841_p9, %p838_p8 }
  0x19   :  { %846 = shalt.err (!%p843_p10)
}
  0x1a   :  { %s847_s8 = scalar_lea.vmem %s30_s27, 64  ;;  %p852_p12 = scmp.lt.s32.totalorder %s30_s27, %s30_s27 }
  0x1b   :  { %p848_p11 = scmp.ne.s32.totalorder %s30_s27, %s847_s8  ;;  %p853_p13 = scmp.lt.s32.totalorder %s847_s8, %s847_s8 }
  0x1d   :  { %p854_p0 = por %p853_p13, %p852_p12 }
  0x1f   :  { %p855_p1 = pnand %p854_p0, %p848_p11 }
  0x21   :  { %858 = shalt.err (!%p855_p1)
}
  0x22   :  { %32 = dma.hbm_to_vmem [thread:$0]  %s1086_s1, 64, %s30_s27, [#allocation7]  }
  0x23   :  { %881 = dma.done.wait [#allocation4], 8192  }
  0x24   :  { %882 = vsyncadd [#allocation4], 4294959104 }
  0x25   :  { %883 = dma.done.wait [#allocation7], 64  }
  0x26   :  { %884 = vsyncadd [#allocation7], 4294967232  ;;  %vm304_vm0 = vcmask 1043456   ;;  %v48_v0 = vld [vmem:[#allocation3] sm:$0xff]  ;;  %v49_v1 = vld [vmem:[#allocation3 + $0x8] sm:$0xff]  ;;  %vm45_vm1 = vcmask 31744  }
  0x27   :  { %v176_v2 = vcombine.high %v48_v0, %v48_v0  ;;  %v177_v3 = vcombine.high %v49_v1, %v49_v1  ;;  %v305_v4 = vsel %vm304_vm0, %v48_v0, 0.0  ;;  %v50_v5 = vld [vmem:[#allocation3 + $0x10] sm:$0xff]  ;;  %v308_v7 = vsel %vm304_vm0, %v49_v1, 0.0  ;;  %v64_v9 = vld [vmem:[#allocation3 + $0x80] sm:$0xff]  ;;  %v65_v12 = vld [vmem:[#allocation3 + $0x88] sm:$0xff]  ;;  %s893_s11 = smov [#allocation8]  }
  0x28   :  { %v178_v10 = vcombine.high %v50_v5, %v50_v5  ;;  %v51_v13 = vld [vmem:[#allocation3 + $0x18] sm:$0xff]  ;;  %v52_v14 = vld [vmem:[#allocation3 + $0x20] sm:$0xff]  ;;  %v53_v16 = vld [vmem:[#allocation3 + $0x28] sm:$0xff]  ;;  %v312_v17 = vsel %vm304_vm0, %v50_v5, 0.0  ;;  %v192_v18 = vcombine.high %v64_v9, %v64_v9  ;;  %v193_v21 = vcombine.high %v65_v12, %v65_v12  ;;  %s724_s12 = sshll.u32 %s893_s11, 4  ;;  %s725_s12 = int_to_ptr.vmem [resolvable:$true] %s724_s12 }
  0x29   :  { %v306_v6 = vsel %vm304_vm0, %v176_v2, 0.0  ;;  %v310_v11 = vsel %vm304_vm0, %v177_v3, 0.0  ;;  %v54_v19 = vld [vmem:[#allocation3 + $0x30] sm:$0xff]  ;;  %v55_v22 = vld [vmem:[#allocation3 + $0x38] sm:$0xff]  ;;  %v179_v23 = vcombine.high %v51_v13, %v51_v13  ;;  %v180_v24 = vcombine.high %v52_v14, %v52_v14  ;;  %v56_v39 = vld [vmem:[#allocation3 + $0x40] sm:$0xff]  ;;  %s859_s13 = scalar_lea.vmem %s725_s12, 128  ;;  %p864_p3 = scmp.lt.s32.totalorder %s725_s12, %s725_s12 }
  0x2a   :  { %v307_v8 = vadd.f32 %v306_v6, %v305_v4  ;;  %v314_v25 = vsel %vm304_vm0, %v178_v10, 0.0  ;;  %v66_v26 = vld [vmem:[#allocation3 + $0x90] sm:$0xff]  ;;  %v371_v27 = vsel %vm304_vm0, %v64_v9, 0.0  ;;  %v181_v28 = vcombine.high %v53_v16, %v53_v16  ;;  %v67_v43 = vld [vmem:[#allocation3 + $0x98] sm:$0xff]  ;;  %v57_v45 = vld [vmem:[#allocation3 + $0x48] sm:$0xff]  ;;  %p860_p2 = scmp.ne.s32.totalorder %s725_s12, %s859_s13  ;;  %p865_p4 = scmp.lt.s32.totalorder %s859_s13, %s859_s13 }
  0x2b   :  { %v372_v30 = vsel %vm304_vm0, %v192_v18, 0.0  ;;  %v374_v31 = vsel %vm304_vm0, %v65_v12, 0.0  ;;  %v182_v32 = vcombine.high %v54_v19, %v54_v19  ;;  %v316_v33 = vsel %vm304_vm0, %v51_v13, 0.0  ;;  %v68_v49 = vld [vmem:[#allocation3 + $0xa0] sm:$0xff]  ;;  %v69_v56 = vld [vmem:[#allocation3 + $0xa8] sm:$0xff]  ;;  %v58_v63 = vld [vmem:[#allocation3 + $0x50] sm:$0xff] }
  0x2c   :  { %v309_v15 = vadd.f32 %v308_v7, %v307_v8  ;;  %v373_v34 = vadd.f32 %v372_v30, %v371_v27  ;;  %v183_v35 = vcombine.high %v55_v22, %v55_v22  ;;  %v194_v37 = vcombine.high %v66_v26, %v66_v26  ;;  %v70_v2 = vld [vmem:[#allocation3 + $0xb0] sm:$0xff]  ;;  %v71_v3 = vld [vmem:[#allocation3 + $0xb8] sm:$0xff]  ;;  %p866_p5 = por %p865_p4, %p864_p3 }
  0x2d   :  { %v376_v38 = vsel %vm304_vm0, %v193_v21, 0.0  ;;  %v318_v40 = vsel %vm304_vm0, %v179_v23, 0.0  ;;  %v320_v41 = vsel %vm304_vm0, %v52_v14, 0.0  ;;  %v322_v42 = vsel %vm304_vm0, %v180_v24, 0.0  ;;  %v59_v18 = vld [vmem:[#allocation3 + $0x58] sm:$0xff] }
  0x2e   :  { %v311_v20 = vadd.f32 %v310_v11, %v309_v15  ;;  %v375_v44 = vadd.f32 %v374_v31, %v373_v34  ;;  %v324_v47 = vsel %vm304_vm0, %v53_v16, 0.0  ;;  %v326_v48 = vsel %vm304_vm0, %v181_v28, 0.0  ;;  %p867_p6 = pnand %p866_p5, %p860_p2 }
  0x2f   :  { %v378_v50 = vsel %vm304_vm0, %v66_v26, 0.0  ;;  %v328_v51 = vsel %vm304_vm0, %v54_v19, 0.0  ;;  %v330_v52 = vsel %vm304_vm0, %v182_v32, 0.0  ;;  %v184_v54 = vcombine.high %v56_v39, %v56_v39 }
  0x30   :  { %v313_v29 = vadd.f32 %v312_v17, %v311_v20  ;;  %v377_v53 = vadd.f32 %v376_v38, %v375_v44  ;;  %v195_v57 = vcombine.high %v67_v43, %v67_v43  ;;  %v380_v58 = vsel %vm304_vm0, %v194_v37, 0.0  ;;  %v72_v20 = vld [vmem:[#allocation3 + $0xc0] sm:$0xff] }
  0x31   :  { %v185_v59 = vcombine.high %v57_v45, %v57_v45  ;;  %v332_v60 = vsel %vm304_vm0, %v55_v22, 0.0  ;;  %v196_v61 = vcombine.high %v68_v49, %v68_v49  ;;  %v338_v0 = vsel %vm304_vm0, %v56_v39, 0.0 }
  0x32   :  { %v315_v36 = vadd.f32 %v314_v25, %v313_v29  ;;  %v379_v62 = vadd.f32 %v378_v50, %v377_v53  ;;  %v382_v4 = vsel %vm304_vm0, %v67_v43, 0.0  ;;  %v339_v5 = vsel %vm304_vm0, %v184_v54, 0.0  ;;  %v73_v25 = vld [vmem:[#allocation3 + $0xc8] sm:$0xff]  ;;  %v60_v29 = vld [vmem:[#allocation3 + $0x60] sm:$0xff]  ;;  %v74_v43 = vld [vmem:[#allocation3 + $0xd0] sm:$0xff] }
  0x33   :  { %v341_v6 = vsel %vm304_vm0, %v57_v45, 0.0  ;;  %v334_v7 = vsel %vm304_vm0, %v183_v35, 0.0  ;;  %v197_v8 = vcombine.high %v69_v56, %v69_v56  ;;  %v340_v10 = vadd.f32 %v339_v5, %v338_v0  ;;  %v80_v5 = vld [vmem:[#allocation3 + $0x100] sm:$0xff] }
  0x34   :  { %v317_v46 = vadd.f32 %v316_v33, %v315_v36  ;;  %v381_v9 = vadd.f32 %v380_v58, %v379_v62  ;;  %v384_v12 = vsel %vm304_vm0, %v195_v57, 0.0  ;;  %v186_v13 = vcombine.high %v58_v63, %v58_v63  ;;  %v75_v62 = vld [vmem:[#allocation3 + $0xd8] sm:$0xff] }
  0x35   :  { %v343_v14 = vsel %vm304_vm0, %v185_v59, 0.0  ;;  %v198_v15 = vcombine.high %v70_v2, %v70_v2  ;;  %v199_v16 = vcombine.high %v71_v3, %v71_v3  ;;  %v342_v19 = vadd.f32 %v341_v6, %v340_v10 }
  0x36   :  { %v319_v55 = vadd.f32 %v318_v40, %v317_v46  ;;  %v383_v17 = vadd.f32 %v382_v4, %v381_v9  ;;  %v386_v22 = vsel %vm304_vm0, %v68_v49, 0.0  ;;  %v388_v23 = vsel %vm304_vm0, %v196_v61, 0.0 }
  0x37   :  { %v345_v24 = vsel %vm304_vm0, %v58_v63, 0.0  ;;  %v390_v27 = vsel %vm304_vm0, %v69_v56, 0.0  ;;  %v392_v28 = vsel %vm304_vm0, %v197_v8, 0.0  ;;  %v344_v30 = vadd.f32 %v343_v14, %v342_v19  ;;  %v63_v8 = vld [vmem:[#allocation3 + $0x78] sm:$0xff]  ;;  %v81_v14 = vld [vmem:[#allocation3 + $0x108] sm:$0xff] }
  0x38   :  { %v321_v1 = vadd.f32 %v320_v41, %v319_v55  ;;  %v385_v26 = vadd.f32 %v384_v12, %v383_v17  ;;  %v187_v32 = vcombine.high %v59_v18, %v59_v18  ;;  %v347_v33 = vsel %vm304_vm0, %v186_v13, 0.0  ;;  %v76_v17 = vld [vmem:[#allocation3 + $0xe0] sm:$0xff] }
  0x39   :  { %v200_v34 = vcombine.high %v72_v20, %v72_v20  ;;  %v394_v36 = vsel %vm304_vm0, %v70_v2, 0.0  ;;  %v346_v37 = vadd.f32 %v345_v24, %v344_v30  ;;  %v201_v38 = vcombine.high %v73_v25, %v73_v25 }
  0x3a   :  { %v323_v11 = vadd.f32 %v322_v42, %v321_v1  ;;  %v387_v35 = vadd.f32 %v386_v22, %v385_v26  ;;  %v396_v40 = vsel %vm304_vm0, %v198_v15, 0.0  ;;  %v188_v41 = vcombine.high %v60_v29, %v60_v29  ;;  %v62_v1 = vld [vmem:[#allocation3 + $0x70] sm:$0xff] }
  0x3b   :  { %v349_v42 = vsel %vm304_vm0, %v59_v18, 0.0  ;;  %v348_v45 = vadd.f32 %v347_v33, %v346_v37  ;;  %v404_v46 = vsel %vm304_vm0, %v72_v20, 0.0  ;;  %v351_v49 = vsel %vm304_vm0, %v187_v32, 0.0  ;;  %v77_v32 = vld [vmem:[#allocation3 + $0xe8] sm:$0xff] }
  0x3c   :  { %v325_v21 = vadd.f32 %v324_v47, %v323_v11  ;;  %v389_v44 = vadd.f32 %v388_v23, %v387_v35  ;;  %v405_v47 = vsel %vm304_vm0, %v200_v34, 0.0  ;;  %v407_v53 = vsel %vm304_vm0, %v73_v25, 0.0 }
  0x3d   :  { %v406_v50 = vadd.f32 %v405_v47, %v404_v46  ;;  %v350_v55 = vadd.f32 %v349_v42, %v348_v45  ;;  %v202_v56 = vcombine.high %v74_v43, %v74_v43  ;;  %v409_v57 = vsel %vm304_vm0, %v201_v38, 0.0 }
  0x3e   :  { %v327_v31 = vadd.f32 %v326_v48, %v325_v21  ;;  %v391_v54 = vadd.f32 %v390_v27, %v389_v44  ;;  %v398_v59 = vsel %vm304_vm0, %v71_v3, 0.0  ;;  %v353_v61 = vsel %vm304_vm0, %v60_v29, 0.0 }
  0x3f   :  { %v408_v63 = vadd.f32 %v407_v53, %v406_v50  ;;  %v352_v2 = vadd.f32 %v351_v49, %v350_v55  ;;  %v411_v4 = vsel %vm304_vm0, %v74_v43, 0.0  ;;  %v355_v10 = vsel %vm304_vm0, %v188_v41, 0.0  ;;  %v83_v43 = vld [vmem:[#allocation3 + $0x118] sm:$0xff]  ;;  %v88_v50 = vld [vmem:[#allocation3 + $0x140] sm:$0xff] }
  0x40   :  { %v329_v39 = vadd.f32 %v328_v51, %v327_v31  ;;  %v61_v51 = vld [vmem:[#allocation3 + $0x68] sm:$0xff]  ;;  %v393_v0 = vadd.f32 %v392_v28, %v391_v54  ;;  %v203_v12 = vcombine.high %v75_v62, %v75_v62  ;;  %v413_v13 = vsel %vm304_vm0, %v202_v56, 0.0  ;;  %v82_v31 = vld [vmem:[#allocation3 + $0x110] sm:$0xff] }
  0x41   :  { %v189_v9 = vcombine.high %v61_v51, %v61_v51  ;;  %v354_v3 = vadd.f32 %v353_v61, %v352_v2  ;;  %v190_v15 = vcombine.high %v62_v1, %v62_v1  ;;  %v208_v19 = vcombine.high %v80_v5, %v80_v5  ;;  %v78_v54 = vld [vmem:[#allocation3 + $0xf0] sm:$0xff]  ;;  %v89_v61 = vld [vmem:[#allocation3 + $0x148] sm:$0xff] }
  0x42   :  { %v331_v48 = vadd.f32 %v330_v52, %v329_v39  ;;  %v400_v52 = vsel %vm304_vm0, %v199_v16, 0.0  ;;  %v395_v11 = vadd.f32 %v394_v36, %v393_v0  ;;  %v357_v16 = vsel %vm304_vm0, %v61_v51, 0.0  ;;  %v84_v0 = vld [vmem:[#allocation3 + $0x120] sm:$0xff] }
  0x43   :  { %v356_v21 = vadd.f32 %v355_v10, %v354_v3  ;;  %v415_v22 = vsel %vm304_vm0, %v75_v62, 0.0  ;;  %v359_v23 = vsel %vm304_vm0, %v189_v9, 0.0  ;;  %v361_v24 = vsel %vm304_vm0, %v62_v1, 0.0 }
  0x44   :  { %v333_v58 = vadd.f32 %v332_v60, %v331_v48  ;;  %v410_v60 = vadd.f32 %v409_v57, %v408_v63  ;;  %v397_v20 = vadd.f32 %v396_v40, %v395_v11  ;;  %v209_v26 = vcombine.high %v81_v14, %v81_v14 }
  0x45   :  { %v358_v28 = vadd.f32 %v357_v16, %v356_v21  ;;  %v204_v29 = vcombine.high %v76_v17, %v76_v17  ;;  %v417_v30 = vsel %vm304_vm0, %v203_v12, 0.0  ;;  %v437_v34 = vsel %vm304_vm0, %v80_v5, 0.0  ;;  %v85_v21 = vld [vmem:[#allocation3 + $0x128] sm:$0xff] }
  0x46   :  { %v335_v6 = vadd.f32 %v334_v7, %v333_v58  ;;  %v412_v18 = vadd.f32 %v411_v4, %v410_v60  ;;  %v191_v7 = vcombine.high %v63_v8, %v63_v8  ;;  %v399_v27 = vadd.f32 %v398_v59, %v397_v20 }
  0x47   :  { %v438_v35 = vsel %vm304_vm0, %v208_v19, 0.0  ;;  %v440_v36 = vsel %vm304_vm0, %v81_v14, 0.0  ;;  %v360_v38 = vadd.f32 %v359_v23, %v358_v28  ;;  %v419_v39 = vsel %vm304_vm0, %v76_v17, 0.0 }
  0x48   :  { %336 = vadd.xlane.f32.xlu0 %v335_v6  ;;  %v414_v25 = vadd.f32 %v413_v13, %v412_v18  ;;  %v401_v37 = vadd.f32 %v400_v52, %v399_v27  ;;  %v439_v40 = vadd.f32 %v438_v35, %v437_v34  ;;  %v363_v41 = vsel %vm304_vm0, %v190_v15, 0.0  ;;  %v90_v15 = vld [vmem:[#allocation3 + $0x150] sm:$0xff]  ;;  %v87_v35 = vld [vmem:[#allocation3 + $0x138] sm:$0xff] }
  0x49   :  { %v210_v44 = vcombine.high %v82_v31, %v82_v31  ;;  %v442_v45 = vsel %vm304_vm0, %v209_v26, 0.0  ;;  %v362_v46 = vadd.f32 %v361_v24, %v360_v38  ;;  %v205_v47 = vcombine.high %v77_v32, %v77_v32  ;;  %v86_v34 = vld [vmem:[#allocation3 + $0x130] sm:$0xff] }
  0x4a   :  { %v416_v33 = vadd.f32 %v415_v22, %v414_v25  ;;  %402 = vadd.xlane.f32.xlu1 %v401_v37  ;;  %v421_v48 = vsel %vm304_vm0, %v204_v29, 0.0  ;;  %v441_v49 = vadd.f32 %v440_v36, %v439_v40  ;;  %v365_v53 = vsel %vm304_vm0, %v63_v8, 0.0  ;;  %v79_v8 = vld [vmem:[#allocation3 + $0xf8] sm:$0xff] }
  0x4b   :  { %v444_v55 = vsel %vm304_vm0, %v82_v31, 0.0  ;;  %v364_v56 = vadd.f32 %v363_v41, %v362_v46  ;;  %v423_v57 = vsel %vm304_vm0, %v77_v32, 0.0  ;;  %v211_v58 = vcombine.high %v83_v43, %v83_v43  ;;  %v96_v32 = vld [vmem:[#allocation3 + $0x180] sm:$0xff] }
  0x4c   :  { %v418_v42 = vadd.f32 %v417_v30, %v416_v33  ;;  %v443_v59 = vadd.f32 %v442_v45, %v441_v49  ;;  %v367_v62 = vsel %vm304_vm0, %v191_v7, 0.0  ;;  %v446_v52 = vsel %vm304_vm0, %v210_v44, 0.0  ;;  %v91_v30 = vld [vmem:[#allocation3 + $0x158] sm:$0xff] }
  0x4d   :  { %v216_v1 = vcombine.high %v88_v50, %v88_v50  ;;  %v366_v2 = vadd.f32 %v365_v53, %v364_v56  ;;  %v206_v4 = vcombine.high %v78_v54, %v78_v54  ;;  %v425_v5 = vsel %vm304_vm0, %v205_v47, 0.0  ;;  %v92_v53 = vld [vmem:[#allocation3 + $0x160] sm:$0xff] }
  0x4e   :  { %v420_v51 = vadd.f32 %v419_v39, %v418_v42  ;;  %v445_v6 = vadd.f32 %v444_v55, %v443_v59  ;;  %v427_v10 = vsel %vm304_vm0, %v78_v54, 0.0  ;;  %v448_v60 = vsel %vm304_vm0, %v83_v43, 0.0  ;;  %v97_v43 = vld [vmem:[#allocation3 + $0x188] sm:$0xff] }
  0x4f   :  { %v217_v11 = vcombine.high %v89_v61, %v89_v61  ;;  %v368_v3 = vadd.f32 %v367_v62, %v366_v2  ;;  %v212_v12 = vcombine.high %v84_v0, %v84_v0  ;;  %v450_v14 = vsel %vm304_vm0, %v211_v58, 0.0  ;;  %v98_v62 = vld [vmem:[#allocation3 + $0x190] sm:$0xff] }
  0x50   :  { %v422_v63 = vadd.f32 %v421_v48, %v420_v51  ;;  %v447_v13 = vadd.f32 %v446_v52, %v445_v6  ;;  %v470_v17 = vsel %vm304_vm0, %v88_v50, 0.0  ;;  %v471_v18 = vsel %vm304_vm0, %v216_v1, 0.0 }
  0x51   :  { %v473_v19 = vsel %vm304_vm0, %v89_v61, 0.0  ;;  %369 = vadd.xlane.f32.xlu0 %v368_v3  ;;  %v207_v20 = vcombine.high %v79_v8, %v79_v8  ;;  %v429_v7 = vsel %vm304_vm0, %v206_v4, 0.0  ;;  %v472_v23 = vadd.f32 %v471_v18, %v470_v17  ;;  %v104_v17 = vld [vmem:[#allocation3 + $0x1c0] sm:$0xff] }
  0x52   :  { %v424_v9 = vadd.f32 %v423_v57, %v422_v63  ;;  %v449_v22 = vadd.f32 %v448_v60, %v447_v13  ;;  %v452_v25 = vsel %vm304_vm0, %v84_v0, 0.0  ;;  %v218_v26 = vcombine.high %v90_v15, %v90_v15 }
  0x53   :  { %v475_v27 = vsel %vm304_vm0, %v217_v11, 0.0  ;;  %v431_v28 = vsel %vm304_vm0, %v79_v8, 0.0  ;;  %v474_v31 = vadd.f32 %v473_v19, %v472_v23  ;;  %v213_v36 = vcombine.high %v85_v21, %v85_v21 }
  0x54   :  { %v426_v16 = vadd.f32 %v425_v5, %v424_v9  ;;  %v451_v29 = vadd.f32 %v450_v14, %v449_v22  ;;  %v454_v37 = vsel %vm304_vm0, %v212_v12, 0.0  ;;  %v477_v38 = vsel %vm304_vm0, %v90_v15, 0.0  ;;  %v93_v5 = vld [vmem:[#allocation3 + $0x168] sm:$0xff]  ;;  %v99_v15 = vld [vmem:[#allocation3 + $0x198] sm:$0xff] }
  0x55   :  { %v433_v39 = vsel %vm304_vm0, %v207_v20, 0.0  ;;  %v456_v41 = vsel %vm304_vm0, %v85_v21, 0.0  ;;  %v476_v42 = vadd.f32 %v475_v27, %v474_v31  ;;  %v219_v45 = vcombine.high %v91_v30, %v91_v30  ;;  %v105_v21 = vld [vmem:[#allocation3 + $0x1c8] sm:$0xff] }
  0x56   :  { %v428_v24 = vadd.f32 %v427_v10, %v426_v16  ;;  %v453_v40 = vadd.f32 %v452_v25, %v451_v29  ;;  %v479_v46 = vsel %vm304_vm0, %v218_v26, 0.0  ;;  %v224_v47 = vcombine.high %v96_v32, %v96_v32  ;;  %v94_v10 = vld [vmem:[#allocation3 + $0x170] sm:$0xff] }
  0x57   :  { %v214_v48 = vcombine.high %v86_v34, %v86_v34  ;;  %v215_v49 = vcombine.high %v87_v35, %v87_v35  ;;  %v478_v54 = vadd.f32 %v477_v38, %v476_v42  ;;  %v458_v55 = vsel %vm304_vm0, %v213_v36, 0.0  ;;  %v106_v38 = vld [vmem:[#allocation3 + $0x1d0] sm:$0xff] }
  0x58   :  { %v430_v33 = vadd.f32 %v429_v7, %v428_v24  ;;  %v455_v50 = vadd.f32 %v454_v37, %v453_v40  ;;  %v481_v56 = vsel %vm304_vm0, %v91_v30, 0.0  ;;  %v225_v57 = vcombine.high %v97_v43, %v97_v43 }
  0x59   :  { %v460_v59 = vsel %vm304_vm0, %v86_v34, 0.0  ;;  %v480_v61 = vadd.f32 %v479_v46, %v478_v54  ;;  %v503_v63 = vsel %vm304_vm0, %v96_v32, 0.0  ;;  %v220_v0 = vcombine.high %v92_v53, %v92_v53  ;;  %v100_v32 = vld [vmem:[#allocation3 + $0x1a0] sm:$0xff] }
  0x5a   :  { %v432_v44 = vadd.f32 %v431_v28, %v430_v33  ;;  %v457_v58 = vadd.f32 %v456_v41, %v455_v50  ;;  %v483_v52 = vsel %vm304_vm0, %v219_v45, 0.0  ;;  %v504_v1 = vsel %vm304_vm0, %v224_v47, 0.0  ;;  %v95_v41 = vld [vmem:[#allocation3 + $0x178] sm:$0xff]  ;;  %v101_v50 = vld [vmem:[#allocation3 + $0x1a8] sm:$0xff] }
  0x5b   :  { %v506_v2 = vsel %vm304_vm0, %v97_v43, 0.0  ;;  %v482_v6 = vadd.f32 %v481_v56, %v480_v61  ;;  %v505_v8 = vadd.f32 %v504_v1, %v503_v63  ;;  %v462_v9 = vsel %vm304_vm0, %v214_v48, 0.0 }
  0x5c   :  { %v434_v51 = vadd.f32 %v433_v39, %v432_v44  ;;  %v459_v4 = vadd.f32 %v458_v55, %v457_v58  ;;  %v485_v60 = vsel %vm304_vm0, %v92_v53, 0.0  ;;  %v226_v11 = vcombine.high %v98_v62, %v98_v62  ;;  %v107_v58 = vld [vmem:[#allocation3 + $0x1d8] sm:$0xff] }
  0x5d   :  { %v508_v3 = vsel %vm304_vm0, %v225_v57, 0.0  ;;  %v464_v13 = vsel %vm304_vm0, %v87_v35, 0.0  ;;  %v484_v14 = vadd.f32 %v483_v52, %v482_v6  ;;  %v507_v16 = vadd.f32 %v506_v2, %v505_v8 }
  0x5e   :  { %435 = vadd.xlane.f32.xlu1 %v434_v51  ;;  %v461_v12 = vadd.f32 %v460_v59, %v459_v4  ;;  %v466_v18 = vsel %vm304_vm0, %v215_v49, 0.0  ;;  %v221_v19 = vcombine.high %v93_v5, %v93_v5  ;;  %v487_v20 = vsel %vm304_vm0, %v220_v0, 0.0 }
  0x5f   :  { %v510_v7 = vsel %vm304_vm0, %v98_v62, 0.0  ;;  %v222_v23 = vcombine.high %v94_v10, %v94_v10  ;;  %v486_v24 = vadd.f32 %v485_v60, %v484_v14  ;;  %v509_v25 = vadd.f32 %v508_v3, %v507_v16 }
  0x60   :  { %v463_v22 = vadd.f32 %v462_v9, %v461_v12  ;;  %v489_v26 = vsel %vm304_vm0, %v93_v5, 0.0  ;;  %v227_v27 = vcombine.high %v99_v15, %v99_v15  ;;  %v512_v28 = vsel %vm304_vm0, %v226_v11, 0.0  ;;  %v102_v5 = vld [vmem:[#allocation3 + $0x1b0] sm:$0xff]  ;;  %v108_v11 = vld [vmem:[#allocation3 + $0x1e0] sm:$0xff] }
  0x61   :  { %v232_v29 = vcombine.high %v104_v17, %v104_v17  ;;  %v488_v31 = vadd.f32 %v487_v20, %v486_v24  ;;  %v511_v33 = vadd.f32 %v510_v7, %v509_v25  ;;  %v233_v34 = vcombine.high %v105_v21, %v105_v21 }
  0x62   :  { %v465_v30 = vadd.f32 %v464_v13, %v463_v22  ;;  %v491_v35 = vsel %vm304_vm0, %v221_v19, 0.0  ;;  %v493_v36 = vsel %vm304_vm0, %v94_v10, 0.0  ;;  %v514_v37 = vsel %vm304_vm0, %v99_v15, 0.0  ;;  %v103_v19 = vld [vmem:[#allocation3 + $0x1b8] sm:$0xff] }
  0x63   :  { %v536_v39 = vsel %vm304_vm0, %v104_v17, 0.0  ;;  %v490_v42 = vadd.f32 %v489_v26, %v488_v31  ;;  %v513_v43 = vadd.f32 %v512_v28, %v511_v33  ;;  %v537_v44 = vsel %vm304_vm0, %v232_v29, 0.0 }
  0x64   :  { %v467_v40 = vadd.f32 %v466_v18, %v465_v30  ;;  %v228_v45 = vcombine.high %v100_v32, %v100_v32  ;;  %v516_v46 = vsel %vm304_vm0, %v227_v27, 0.0  ;;  %v538_v47 = vadd.f32 %v537_v44, %v536_v39 }
  0x65   :  { %v539_v48 = vsel %vm304_vm0, %v105_v21, 0.0  ;;  %v492_v49 = vadd.f32 %v491_v35, %v490_v42  ;;  %v515_v53 = vadd.f32 %v514_v37, %v513_v43  ;;  %v234_v54 = vcombine.high %v106_v38, %v106_v38  ;;  %v111_v43 = vld [vmem:[#allocation3 + $0x1f8] sm:$0xff] }
  0x66   :  { %468 = vadd.xlane.f32.xlu0 %v467_v40  ;;  %v541_v51 = vsel %vm304_vm0, %v233_v34, 0.0  ;;  %v223_v55 = vcombine.high %v95_v41, %v95_v41  ;;  %v495_v56 = vsel %vm304_vm0, %v222_v23, 0.0  ;;  %v518_v57 = vsel %vm304_vm0, %v100_v32, 0.0  ;;  %v109_v23 = vld [vmem:[#allocation3 + $0x1e8] sm:$0xff]  ;;  %v110_v34 = vld [vmem:[#allocation3 + $0x1f0] sm:$0xff] }
  0x67   :  { %v540_v59 = vadd.f32 %v539_v48, %v538_v47  ;;  %v494_v61 = vadd.f32 %v493_v36, %v492_v49  ;;  %v517_v62 = vadd.f32 %v516_v46, %v515_v53  ;;  %v543_v63 = vsel %vm304_vm0, %v106_v38, 0.0 }
  0x68   :  { %v497_v0 = vsel %vm304_vm0, %v95_v41, 0.0  ;;  %v229_v52 = vcombine.high %v101_v50, %v101_v50  ;;  %v520_v1 = vsel %vm304_vm0, %v228_v45, 0.0  ;;  %v235_v8 = vcombine.high %v107_v58, %v107_v58 }
  0x69   :  { %v542_v2 = vadd.f32 %v541_v51, %v540_v59  ;;  %v496_v4 = vadd.f32 %v495_v56, %v494_v61  ;;  %v519_v6 = vadd.f32 %v518_v57, %v517_v62  ;;  %v545_v9 = vsel %vm304_vm0, %v234_v54, 0.0 }
  0x6a   :  { %v499_v10 = vsel %vm304_vm0, %v223_v55, 0.0  ;;  %v522_v60 = vsel %vm304_vm0, %v101_v50, 0.0  ;;  %v547_v14 = vsel %vm304_vm0, %v107_v58, 0.0  ;;  %v230_v15 = vcombine.high %v102_v5, %v102_v5  ;;  %v633_v58 = vld [vmem:[#allocation6] sm:$0xf] }
  0x6b   :  { %v544_v3 = vadd.f32 %v543_v63, %v542_v2  ;;  %v498_v12 = vadd.f32 %v497_v0, %v496_v4  ;;  %v521_v13 = vadd.f32 %v520_v1, %v519_v6  ;;  %v524_v16 = vsel %vm304_vm0, %v229_v52, 0.0 }
  0x6c   :  { %v236_v7 = vcombine.high %v108_v11, %v108_v11  ;;  %v549_v21 = vsel %vm304_vm0, %v235_v8, 0.0  ;;  %v526_v22 = vsel %vm304_vm0, %v102_v5, 0.0  ;;  %v551_v26 = vsel %vm304_vm0, %v108_v11, 0.0 }
  0x6d   :  { %v546_v17 = vadd.f32 %v545_v9, %v544_v3  ;;  %v500_v18 = vadd.f32 %v499_v10, %v498_v12  ;;  %v523_v20 = vadd.f32 %v522_v60, %v521_v13  ;;  %v231_v27 = vcombine.high %v103_v19, %v103_v19 }
  0x6e   :  { %v528_v28 = vsel %vm304_vm0, %v230_v15, 0.0  ;;  %v237_v31 = vcombine.high %v109_v23, %v109_v23  ;;  %v553_v32 = vsel %vm304_vm0, %v236_v7, 0.0  ;;  %v530_v33 = vsel %vm304_vm0, %v103_v19, 0.0 }
  0x6f   :  { %v548_v24 = vadd.f32 %v547_v14, %v546_v17  ;;  %501 = vadd.xlane.f32.xlu1 %v500_v18  ;;  %v525_v25 = vadd.f32 %v524_v16, %v523_v20  ;;  %v555_v37 = vsel %vm304_vm0, %v109_v23, 0.0  ;;  %v532_v38 = vsel %vm304_vm0, %v231_v27, 0.0 }
  0x70   :  { %v238_v41 = vcombine.high %v110_v34, %v110_v34  ;;  %v557_v42 = vsel %vm304_vm0, %v237_v31, 0.0  ;;  %v559_v46 = vsel %vm304_vm0, %v110_v34, 0.0  ;;  %v239_v48 = vcombine.high %v111_v43, %v111_v43 }
  0x71   :  { %v550_v29 = vadd.f32 %v549_v21, %v548_v24  ;;  %v527_v30 = vadd.f32 %v526_v22, %v525_v25  ;;  %v563_v53 = vsel %vm304_vm0, %v111_v43, 0.0  ;;  %v891_v57 = vmov 0.0   ;;  %v734_v24 = vld [vmem:[%s1087_s2] ss:$0 sm:$0xff] }
  0x72   :  { %v561_v49 = vsel %vm304_vm0, %v238_v41, 0.0  ;;  %v565_v51 = vsel %vm304_vm0, %v239_v48, 0.0  ;;  %739 = vmatprep.subr.mxu0 %v891_v57  ;;  %46 = vst.msk [vmem:[#allocation2] sm:$0xff] %vm45_vm1, %v891_v57  ;;  %vm892_vm2 = vmmov 0   ;;  %v577_v59 = vlaneseq }
  0x73   :  { %v552_v35 = vadd.f32 %v551_v26, %v550_v29  ;;  %v529_v36 = vadd.f32 %v528_v28, %v527_v30  ;;  %740 = vmatpush3.msk.msra.mxu0 %vm304_vm0, %v633_v58  ;;  %741 = vmatprep.mubr.msk.f32.mxu0 %vm892_vm2, %v891_v57  ;;  %vm611_vm3 = vcmask 1041409   ;;  %vm613_vm4 = vcmask 1042434  }
  0x74   :  { %v578_v62 = vand.u32 127, %v577_v59  ;;  %v580_v63 = vshrl.u32 %v577_v59, 7  ;;  %vm615_vm5 = vcmask 1043459   ;;  %vm617_vm6 = vcmask 1044484  }
  0x75   :  { %v554_v39 = vadd.f32 %v553_v32, %v552_v35  ;;  %v531_v40 = vadd.f32 %v530_v33, %v529_v36  ;;  %vm619_vm7 = vcmask 1045509   ;;  %vm621_vm8 = vcmask 1046534  }
  0x76   :  { %v581_v1 = vsub.s32 %v578_v62, %v580_v63  ;;  %vm623_vm9 = vcmask 1047559  }
  0x77   :  { %v556_v44 = vadd.f32 %v555_v37, %v554_v39  ;;  %v533_v45 = vadd.f32 %v532_v38, %v531_v40 }
  0x79   :  { %v558_v47 = vadd.f32 %v557_v42, %v556_v44  ;;  %534 = vadd.xlane.f32.xlu0 %v533_v45  ;;  %v47_v7 = vld [vmem:[#allocation2] sm:$0xff] }
  0x7b   :  { %v560_v50 = vadd.f32 %v559_v46, %v558_v47 }
  0x7d   :  { %v562_v54 = vadd.f32 %v561_v49, %v560_v50 }
  0x7f   :  { %v564_v55 = vadd.f32 %v563_v53, %v562_v54 }
  0x81   :  { %v566_v56 = vadd.f32 %v565_v51, %v564_v55 }
  0x83   :  { %567 = vadd.xlane.f32.xlu1 %v566_v56 }
  0xd5   :  { %v337_v61 = vpop.xlane.xlu0 %336 }
  0xd6   :  { %v582_v4 = vrot.slane %v337_v61, %v581_v1 }
  0xd7   :  { %v403_v0 = vpop.xlane.xlu1 %402 }
  0xd8   :  { %v590_v9 = vrot.slane %v403_v0, %v581_v1 }
  0xde   :  { %v370_v52 = vpop.xlane.xlu0 %369 }
  0xdf   :  { %v586_v2 = vrot.slane %v370_v52, %v581_v1 }
  0xe1   :  { %v612_v6 = vsel %vm611_vm3, %v586_v2, %v582_v4 }
  0xe2   :  { %v614_v60 = vsel %vm613_vm4, %v590_v9, %v612_v6 }
  0xeb   :  { %v436_v5 = vpop.xlane.xlu1 %435 }
  0xec   :  { %v594_v10 = vrot.slane %v436_v5, %v581_v1 }
  0xee   :  { %v616_v12 = vsel %vm615_vm5, %v594_v10, %v614_v60 }
  0xf3   :  { %v469_v8 = vpop.xlane.xlu0 %468 }
  0xf4   :  { %v598_v11 = vrot.slane %v469_v8, %v581_v1 }
  0xf6   :  { %v618_v15 = vsel %vm617_vm6, %v598_v11, %v616_v12 }
  0xfc   :  { %v502_v3 = vpop.xlane.xlu1 %501 }
  0xfd   :  { %v602_v14 = vrot.slane %v502_v3, %v581_v1 }
  0xff   :  { %v620_v17 = vsel %vm619_vm7, %v602_v14, %v618_v15 }
 0x106   :  { %v535_v13 = vpop.xlane.xlu0 %534 }
 0x107   :  { %v606_v16 = vrot.slane %v535_v13, %v581_v1 }
 0x109   :  { %v622_v18 = vsel %vm621_vm8, %v606_v16, %v620_v17 }
 0x110   :  { %v568_v19 = vpop.xlane.xlu1 %567 }
 0x111   :  { %v610_v20 = vrot.slane %v568_v19, %v581_v1 }
 0x113   :  { %v624_v21 = vsel %vm623_vm9, %v610_v20, %v622_v18 }
 0x114   :  { %v626_v22 = vadd.f32 %v624_v21, %v47_v7 }
 0x116   :  { %628 = vst.msk [vmem:[#allocation2] sm:$0xff] %vm45_vm1, %v626_v22 }
 0x11d   :  { %v632_v23 = vld [vmem:[#allocation2] sm:$0xff] }
 0x11e   :  { %742 = vmatmul.mubr.msk.f32.vlgmr.msra.gmra.mrb[0].mxu0 %vm45_vm1, %v632_v23 }
 0x1f1   :  { %v713_v25 = vpop.f32.mrb[0].mxu0 }
 0x1f2   :  { %v714_v26 = vadd.f32 %v734_v24, %v713_v25  ;;  %v743_v27 = vpop.f32.mrb[1].mxu0 }
 0x1f4   :  { %717 = vst [vmem:[#allocation8] sm:$0xff] %v714_v26 }
 0x1f5   :  { %870 = shalt.err (!%p867_p6)
}
 0x1f6   :  { %s871_s16 = scalar_lea.hbm %s1088_s3, 128 }
 0x1f7   :  { %p872_p7 = scmp.ne.s32.totalorder %s1088_s3, %s871_s16  ;;  %p875_p8 = scmp.lt.u32.totalorder %s871_s16, %s1088_s3 }
 0x1f9   :  { %p877_p9 = pnand %p875_p8, %p872_p7 }
 0x1fb   :  { %880 = shalt.err (!%p877_p9)
}
 0x1fc   :  { %727 = dma.vmem_to_hbm [thread:$0]  %s725_s12, 128, %s1088_s3, [#allocation5]  }
 0x1fd   :  { %885 = dma.done.wait [#allocation5], 128  }
 0x1fe   :  { %886 = vsyncadd [#allocation5], 4294967168 }
 0x1ff   :  { %731 = vsyncpa [#allocation4], 1 }
 0x200   :  { %732 = vsyncpa [#allocation7], 1 }
 0x201   :  { %733 = vsyncpa [#allocation5], 1 }

</bundles_post_ra>
